<compile_context>
chip_gen: v7x
topology: tpu7x:2x2x1
jax: 0.10.0
libtpu: 0.0.40
codegen_flags: <defaults>
</compile_context>

<pallas_src>
import functools

import jax
import jax.numpy as jnp
from jax import lax
from jax.experimental import pallas as pl
from jax.experimental.pallas import tpu as pltpu


# ----------------------------------------------------------------------------
# Generation-aware VMEM budget
# ----------------------------------------------------------------------------
@functools.lru_cache(maxsize=None)
def _vmem_limit_bytes():
    """Scoped-VMEM request: ~75% of per-core VMEM, capped at 100 MiB."""
    cap = None
    try:
        cap = int(pltpu.get_tpu_info().vmem_capacity_bytes)
    except Exception:
        cap = None
    if not cap:
        cap = 64 * 1024 * 1024  # conservative fallback (works on every generation)
    return min(int(0.75 * cap), 100 * 1024 * 1024)


def _vmem_plan_bytes():
    """Planning budget with extra headroom for compiler-internal scratch."""
    return int(0.80 * _vmem_limit_bytes())


def _compiler(dimension_semantics):
    return pltpu.CompilerParams(
        dimension_semantics=dimension_semantics,
        vmem_limit_bytes=_vmem_limit_bytes(),
    )


# ----------------------------------------------------------------------------
# Fused slab-resident kernel: one batch element per grid step (grid=(B,)).
# ----------------------------------------------------------------------------
def _se_fused_kernel(x_ref, w1t_ref, w2t_ref, o_ref, *, inv_L):
    # Squeeze: pooled mean, accumulated in f32; stays O(C), never O(C*L).
    y = jnp.sum(x_ref[...], axis=-1, dtype=jnp.float32) * inv_L                 # (1, C)
    # Excite: fc1 -> relu -> fc2 -> sigmoid (weights pre-transposed, no in-kernel .T).
    h = jnp.maximum(
        jnp.dot(y, w1t_ref[...], preferred_element_type=jnp.float32), 0.0)      # (1, C_red)
    s = jax.nn.sigmoid(
        jnp.dot(h, w2t_ref[...], preferred_element_type=jnp.float32))           # (1, C)
    # Scale: re-read x_ref (cheap VMEM loads) so no multi-MiB value stays live; the big
    # slab never leaves its native dtype, only the tiny gate is cast down once.
    o_ref[...] = (x_ref[...] * s[:, :, None].astype(o_ref.dtype)).astype(o_ref.dtype)


# ----------------------------------------------------------------------------
# Two-pass streaming kernels (when the per-batch slab doesn't fit VMEM).
# ----------------------------------------------------------------------------
def _se_pool_kernel(x_ref, sum_ref, *, L, TL, needs_mask):
    # grid = (B, nL); the L axis is the reduction ("arbitrary", last).
    li = pl.program_id(1)

    @pl.when(li == 0)
    def _():
        sum_ref[...] = jnp.zeros_like(sum_ref)

    x = x_ref[...]                                        # (1, C, TL) native dtype
    if needs_mask:
        # Ragged last tile: zero out the out-of-bounds lanes before reducing.
        idx = lax.broadcasted_iota(jnp.int32, x.shape, dimension=2)
        x = jnp.where(idx < (L - li * TL), x, 0)
    sum_ref[...] += jnp.sum(x, axis=-1, dtype=jnp.float32)                       # (1, C)


def _se_scale_kernel(x_ref, s_ref, o_ref):
    # x_ref: (1, C, TL); s_ref: (1, C, 1) already in x's dtype.
    o_ref[...] = (x_ref[...] * s_ref[...]).astype(o_ref.dtype)


def _choose_l_tile(C, L, itemsize, n_buffers, budget):
    """Largest multiple-of-128 L tile whose n_buffers-buffered (1,C,TL) tiles fit `budget`."""
    per_l_bytes = max(1, n_buffers * C * itemsize)
    max_tl = max(1, budget // per_l_bytes)
    if max_tl >= L:
        return L
    tl = (max_tl // 128) * 128
    if tl >= 128:
        return tl
    # TODO(synk): tiny budget / huge C -> consider (B, L, C) layout with C on lanes.
    return max(1, max_tl)


# ----------------------------------------------------------------------------
# Wrapper
# ----------------------------------------------------------------------------
def se_block(x, w1, w2, *, force_tiled=False, l_tile=None, donate_x=False):
    """SEBlock forward.

    x : (B, C, L)                float32 / bfloat16 (output dtype == x.dtype)
    w1: (C//r, C)   = fc[0].weight  (PyTorch Linear layout: (out, in))
    w2: (C, C//r)   = fc[2].weight
    donate_x: alias x's HBM buffer to the output (capacity-only win).
    """
    B, C, L = x.shape
    C_red = w1.shape[0]
    assert w1.shape == (C_red, C) and w2.shape == (C, C_red)

    itemsize = jnp.dtype(x.dtype).itemsize

    # Pre-transpose the tiny weights in the wrapper (free layout plumbing, no in-kernel .T).
    w1t = jnp.asarray(w1).T   # (C, C_red)
    w2t = jnp.asarray(w2).T   # (C_red, C)
    w_bytes = 2 * (w1t.size * jnp.dtype(w1t.dtype).itemsize
                   + w2t.size * jnp.dtype(w2t.dtype).itemsize)

    plan = _vmem_plan_bytes()
    # Fused path: double-buffered in + out slabs, one temp slab of margin, weights, slack.
    fused_need = 5 * C * L * itemsize + w_bytes + (2 << 20)
    use_fused = (not force_tiled) and (l_tile is None) and (fused_need <= plan)

    io_alias = {0: 0} if donate_x else {}

    if use_fused:
        # TODO(synk): on v7x with B == 1, grid=(B,) leaves one TensorCore idle; by roofline
        # arithmetic the 3-pass streaming alternative is a wash, so keep the fused path.
        return pl.pallas_call(
            functools.partial(_se_fused_kernel, inv_L=1.0 / L),
            out_shape=jax.ShapeDtypeStruct((B, C, L), x.dtype),
            grid=(B,),
            in_specs=[
                pl.BlockSpec((1, C, L), lambda b: (b, 0, 0)),
                pl.BlockSpec((C, C_red), lambda b: (0, 0)),
                pl.BlockSpec((C_red, C), lambda b: (0, 0)),
            ],
            out_specs=pl.BlockSpec((1, C, L), lambda b: (b, 0, 0)),
            compiler_params=_compiler(("parallel",)),
            input_output_aliases=io_alias,
        )(x, w1t, w2t)

    # ---- Two-pass streaming path ----
    # Pass 1 (pool) streams only x in  -> 2 double-buffered tiles of (1, C, TL).
    # Pass 2 (scale) streams x in + out -> 4 tiles.  Size the two tiles independently.
    if l_tile is not None:
        tl_pool = tl_scale = int(l_tile)
    else:
        tl_pool = _choose_l_tile(C, L, itemsize, n_buffers=2, budget=plan)
        tl_scale = _choose_l_tile(C, L, itemsize, n_buffers=4, budget=plan)

    n_pool = pl.cdiv(L, tl_pool)
    n_scale = pl.cdiv(L, tl_scale)

    # Pass 1: per-(B, C) pooled f32 sum, accumulated across L tiles (reduction axis last,
    # "arbitrary"); ragged last tile masked in-kernel.
    pooled = pl.pallas_call(
        functools.partial(_se_pool_kernel, L=L, TL=tl_pool,
                          needs_mask=(L % tl_pool != 0)),
        out_shape=jax.ShapeDtypeStruct((B, C), jnp.float32),
        grid=(B, n_pool),
        in_specs=[pl.BlockSpec((1, C, tl_pool), lambda b, l: (b, 0, l))],
        out_specs=pl.BlockSpec((1, C), lambda b, l: (b, 0)),
        compiler_params=_compiler(("parallel", "arbitrary")),
    )(x)

    # Tiny batched excite as one XLA op (MXU is slack on this mem-bound kernel); this also
    # keeps the weights out of the streamed pass's VMEM budget.
    y = pooled * jnp.float32(1.0 / L)                                   # (B, C) f32
    h = jnp.maximum(y @ w1t.astype(jnp.float32), 0.0)                   # (B, C_red)
    s = jax.nn.sigmoid(h @ w2t.astype(jnp.float32))                     # (B, C)
    s = s[:, :, None].astype(x.dtype)                                   # (B, C, 1)

    # Pass 2: stream x again and scale; both grid axes fully independent.
    return pl.pallas_call(
        _se_scale_kernel,
        out_shape=jax.ShapeDtypeStruct((B, C, L), x.dtype),
        grid=(B, n_scale),
        in_specs=[
            pl.BlockSpec((1, C, tl_scale), lambda b, l: (b, 0, l)),
            pl.BlockSpec((1, C, 1), lambda b, l: (b, 0, 0)),
        ],
        out_specs=pl.BlockSpec((1, C, tl_scale), lambda b, l: (b, 0, l)),
        compiler_params=_compiler(("parallel", "parallel")),
        input_output_aliases=io_alias,
    )(x, s)


def se_block_ref(x, w1, w2):
    """Pure-JAX reference matching the PyTorch forward."""
    y = jnp.mean(x, axis=-1)                       # (B, C)
    h = jnp.maximum(y @ w1.T, 0.0)                 # (B, C//r)
    s = jax.nn.sigmoid(h @ w2.T)                   # (B, C)
    return x * s[:, :, None]


if __name__ == "__main__":
    B, C, L = 2, 32, 16
    reduction = 16
    C_red = C // reduction  # 2

    key = jax.random.PRNGKey(0)
    kx, k1, k2 = jax.random.split(key, 3)

    x = jax.random.normal(kx, (B, C, L), dtype=jnp.float32)
    # PyTorch Linear stores weights as (out_features, in_features)
    w1 = jax.random.normal(k1, (C_red, C), dtype=jnp.float32) * 0.1  # fc[0].weight
    w2 = jax.random.normal(k2, (C, C_red), dtype=jnp.float32) * 0.1  # fc[2].weight

    # Primary (fused, slab-resident) path at the module's small shape.
    out = jax.block_until_ready(se_block(x, w1, w2))
    ref = se_block_ref(x, w1, w2)
    assert out.shape == (B, C, L)
    assert jnp.allclose(out, ref, atol=1e-5, rtol=1e-5)

    # Two-pass streaming path with lane-dense 128-wide tiles that do NOT divide L
    # (exercises pl.cdiv grids + in-kernel masking of the ragged last tile).
    L2 = 300
    x2 = jax.random.normal(kx, (B, C, L2), dtype=jnp.float32)
    ref2 = se_block_ref(x2, w1, w2)
    out2 = jax.block_until_ready(se_block(x2, w1, w2, force_tiled=True, l_tile=128))
    assert out2.shape == (B, C, L2)
    assert jnp.allclose(out2, ref2, atol=1e-5, rtol=1e-5)

    # Streaming path with per-pass automatic tile sizing.
    out3 = jax.block_until_ready(se_block(x2, w1, w2, force_tiled=True))
    assert jnp.allclose(out3, ref2, atol=1e-5, rtol=1e-5)

    print("KERNEL_OK")
</pallas_src>

<mosaic_0001>
module attributes {stable_mosaic.version = 11 : i64} {
  func.func @_se_fused_kernel(%arg0: i32, %arg1: memref<1x32x16xf32, #tpu.memory_space<vmem>>, %arg2: memref<32x2xf32, #tpu.memory_space<vmem>>, %arg3: memref<2x32xf32, #tpu.memory_space<vmem>>, %arg4: memref<1x32x16xf32, #tpu.memory_space<vmem>>) attributes {dimension_semantics = [#tpu.dimension_semantics<parallel>], iteration_bounds = array<i64: 2>, scalar_prefetch = 0 : i64, scratch_operands = 0 : i64, tpu.core_type = #tpu.core_type<tc>, window_params = [{transform_indices = @transform_0, window_bounds = array<i64: 1, 32, 16>}, {pipeline_mode = #tpu.pipeline_mode<synchronous>, transform_indices = @transform_1, window_bounds = array<i64: 32, 2>}, {pipeline_mode = #tpu.pipeline_mode<synchronous>, transform_indices = @transform_2, window_bounds = array<i64: 2, 32>}, {transform_indices = @transform_3, window_bounds = array<i64: 1, 32, 16>}]} {
    %c0 = arith.constant 0 : index
    %c0_0 = arith.constant 0 : index
    %c0_1 = arith.constant 0 : index
    %0 = vector.load %arg1[%c0, %c0_0, %c0_1] : memref<1x32x16xf32, #tpu.memory_space<vmem>>, vector<1x32x16xf32>
    %cst = arith.constant dense<0.000000e+00> : vector<1x32xf32>
    %1 = vector.multi_reduction <add>, %0, %cst [2] : vector<1x32x16xf32> to vector<1x32xf32>
    %cst_2 = arith.constant 6.250000e-02 : f32
    %2 = vector.broadcast %cst_2 : f32 to vector<1x32xf32>
    %3 = arith.mulf %1, %2 : vector<1x32xf32>
    %c0_3 = arith.constant 0 : index
    %c0_4 = arith.constant 0 : index
    %4 = vector.load %arg2[%c0_3, %c0_4] : memref<32x2xf32, #tpu.memory_space<vmem>>, vector<32x2xf32>
    %cst_5 = arith.constant dense<0.000000e+00> : vector<1x2xf32>
    %5 = tpu.matmul %3, %4, %cst_5 {dimension_numbers = #tpu.dot_dimension_numbers<[1], [0], [0], [1], [0, 0, 1, 1], [], []>} : vector<1x32xf32>, vector<32x2xf32>, vector<1x2xf32> -> vector<1x2xf32>
    %cst_6 = arith.constant 0.000000e+00 : f32
    %6 = vector.broadcast %cst_6 : f32 to vector<1x2xf32>
    %7 = arith.maximumf %5, %6 : vector<1x2xf32>
    %c0_7 = arith.constant 0 : index
    %c0_8 = arith.constant 0 : index
    %8 = vector.load %arg3[%c0_7, %c0_8] : memref<2x32xf32, #tpu.memory_space<vmem>>, vector<2x32xf32>
    %cst_9 = arith.constant dense<0.000000e+00> : vector<1x32xf32>
    %9 = tpu.matmul %7, %8, %cst_9 {dimension_numbers = #tpu.dot_dimension_numbers<[1], [0], [0], [1], [0, 0, 1, 1], [], []>} : vector<1x2xf32>, vector<2x32xf32>, vector<1x32xf32> -> vector<1x32xf32>
    %10 = arith.negf %9 : vector<1x32xf32>
    %11 = math.exp %10 : vector<1x32xf32>
    %cst_10 = arith.constant 1.000000e+00 : f32
    %12 = vector.broadcast %cst_10 : f32 to vector<1x32xf32>
    %13 = arith.addf %12, %11 : vector<1x32xf32>
    %14 = arith.divf %12, %13 : vector<1x32xf32>
    %c0_11 = arith.constant 0 : index
    %c0_12 = arith.constant 0 : index
    %c0_13 = arith.constant 0 : index
    %15 = vector.load %arg1[%c0_11, %c0_12, %c0_13] : memref<1x32x16xf32, #tpu.memory_space<vmem>>, vector<1x32x16xf32>
    %16 = vector.shape_cast %14 : vector<1x32xf32> to vector<1x32x1xf32>
    %17 = vector.broadcast %16 : vector<1x32x1xf32> to vector<1x32x16xf32>
    %18 = arith.mulf %15, %17 : vector<1x32x16xf32>
    %c0_14 = arith.constant 0 : index
    %c0_15 = arith.constant 0 : index
    %c0_16 = arith.constant 0 : index
    %19 = vector.load %arg4[%c0_14, %c0_15, %c0_16] : memref<1x32x16xf32, #tpu.memory_space<vmem>>, vector<1x32x16xf32>
    tpu.vector_store %arg4[%c0_14, %c0_15, %c0_16], %18 {strides = array<i32>} : memref<1x32x16xf32, #tpu.memory_space<vmem>>, vector<1x32x16xf32>,
    return
  }
  func.func @transform_0(%arg0: i32) -> (i32, i32, i32) {
    %c0_i32 = arith.constant 0 : i32
    %c0_i32_0 = arith.constant 0 : i32
    %c0_i32_1 = arith.constant 0 : i32
    return %arg0, %c0_i32, %c0_i32_0 : i32, i32, i32
  }
  func.func @transform_1(%arg0: i32) -> (i32, i32) {
    %c0_i32 = arith.constant 0 : i32
    %c0_i32_0 = arith.constant 0 : i32
    %c0_i32_1 = arith.constant 0 : i32
    return %c0_i32, %c0_i32_0 : i32, i32
  }
  func.func @transform_2(%arg0: i32) -> (i32, i32) {
    %c0_i32 = arith.constant 0 : i32
    %c0_i32_0 = arith.constant 0 : i32
    %c0_i32_1 = arith.constant 0 : i32
    return %c0_i32, %c0_i32_0 : i32, i32
  }
  func.func @transform_3(%arg0: i32) -> (i32, i32, i32) {
    %c0_i32 = arith.constant 0 : i32
    %c0_i32_0 = arith.constant 0 : i32
    %c0_i32_1 = arith.constant 0 : i32
    return %arg0, %c0_i32, %c0_i32_0 : i32, i32, i32
  }
}

</mosaic_0001>

<bundles_post_ra>
// kernel: tpu_custom_call.1
= control target key start
LH: loop header
LB: loop body
LE: loop exit
PB: predicated region body
PF: predicated region fallthrough
CT: control target
= control target key end

     0   :  { %s560_s12 = smov 0   ;;  %s623_s0 = inlined_call_operand.vmem [shape: f32[2,32,16], index: 0, kind: input, shape index: {}]   ;;  %s624_s1 = inlined_call_operand.vmem [shape: f32[32,2], index: 1, kind: input, shape index: {}]   ;;  %s625_s2 = inlined_call_operand.vmem [shape: f32[2,32], index: 2, kind: input, shape index: {}]   ;;  %s626_s3 = inlined_call_operand.vmem [shape: f32[2,32,16], index: 3, kind: output, shape index: {}]  }
   0x1 LB: > { %s468_s13 = sadd.s32 4294967295, %s535_s12   ;;  %p472_p0 = scmp.ge.s32.totalorder %s535_s12, 1  ;;  %s535_s12 = sphi %s560_s12, %s13_s12  }
   0x2   : > { %p137_p1 = scmp.lt.s32.totalorder %s535_s12, 3 }
   0x4   : > { %p138_p2 = pnand %p472_p0, %p137_p1 }
   0x5   : > { %p161_p3 = scmp.lt.s32.totalorder (!%p138_p2), %s468_s13, 1  ;;  %vm175_vm0 = vcmask (!%p138_p2), 130048   ;;  %v192_v8 = vld [vmem:[%s624_s1] sm:$0xff] (!%p138_p2)  ;;  %v193_v9 = vld [vmem:[%s624_s1 + $0x8] sm:$0xff] (!%p138_p2)  ;;  %v537_v10 = vmov (!%p138_p2), 0.0|0.0   ;;  %v194_v12 = vld [vmem:[%s624_s1 + $0x10] sm:$0xff] (!%p138_p2)  ;;  %v200_v16 = vlaneseq (!%p138_p2) }
   0x6   : > { %141 = sbr.rel (%p138_p2) target bundleno = 751 (0x2ef), region = 32  ;;  %508 = vmatprep.subr.bf16.mxu0 (!%p138_p2), %v537_v10  ;;  %v509_v11 = vpack.c.bf16 (!%p138_p2), %v193_v9, %v192_v8  ;;  %v195_v13 = vld [vmem:[%s624_s1 + $0x18] sm:$0xff] (!%p138_p2)  ;;  %vm538_vm1 = vmmov (!%p138_p2), 0   ;;  %v539_v15 = vmov (!%p138_p2), 0.0   ;;  %vm211_vm2 = vcmask (!%p138_p2), 130112  }
   0x7   : > { %v512_v14 = vpack.c.bf16 (!%p138_p2), %v195_v13, %v194_v12  ;;  %500 = vmatprep.mubr.msk.f32.mxu0 (!%p138_p2), %vm538_vm1, %v539_v15  ;;  %503 = vmatprep.subr.mxu1 (!%p138_p2), %v539_v15  ;;  %v201_v17 = vand.u32 (!%p138_p2), 127, %v200_v16  ;;  %v203_v18 = vshrl.u32 (!%p138_p2), %v200_v16, 7  ;;  %vm218_vm3 = vcmask (!%p138_p2), 195712   ;;  %v301_v41 = vld [vmem:[%s625_s2] sm:$0x3] (!%p138_p2) }
   0x8   : > { %510 = vmatpush3.bf16.msra.mxu0 (!%p138_p2), %v509_v11  ;;  %505 = vmatprep.mubr.msk.f32.mxu1 (!%p138_p2), %vm538_vm1, %v539_v15  ;;  %vm225_vm4 = vcmask (!%p138_p2), 261312   ;;  %vm227_vm5 = vcmask (!%p138_p2), 261120   ;;  %vm306_vm6 = vcmask (!%p138_p2), 1041408   ;;  %vm302_vm7 = vcmask (!%p138_p2), 15360  }
   0x9   : > { %511 = vmatprep.subr.bf16.mxu0 (!%p138_p2), %v537_v10  ;;  %v206_v19 = vadd.s32 (!%p138_p2), 4294967288, %v201_v17  ;;  %v220_v20 = vadd.s32 (!%p138_p2), 4294967272, %v201_v17  ;;  %v213_v22 = vadd.s32 (!%p138_p2), 4294967280, %v201_v17  ;;  %v204_v24 = vsub.s32 (!%p138_p2), %v201_v17, %v203_v18  ;;  %504 = vmatpush3.msk.msra.mxu1 (!%p138_p2), %vm306_vm6, %v301_v41 }
   0xa   : > { %v388_v50 = vsub.s32 (!%p138_p2), 0, %v203_v18 }
   0xb   : > { %v209_v26 = vsub.s32 (!%p138_p2), %v206_v19, %v203_v18  ;;  %v223_v27 = vsub.s32 (!%p138_p2), %v220_v20, %v203_v18  ;;  %v216_v28 = vsub.s32 (!%p138_p2), %v213_v22, %v203_v18 }
   0xc   : > { %513 = vmatpush3.bf16.msra.mxu0 (!%p138_p2), %v512_v14 }
   0xd   : > { %s628_s13 = smov (!%p161_p3, %s468_s13), 1 }
   0xe   : > { %s483_s14 = sshll.u32 %s628_s13, 5 }
   0xf   : > { %s165_s17 = scalar_lea.vmem %s623_s0, %s483_s14  ;;  %s170_s30 = scalar_lea.vmem %s626_s3, %s483_s14 }
  0x10   : > { %v576_v0 = vld [vmem:[%s165_s17] sm:$0xff]  ;;  %v578_v1 = vld [vmem:[%s165_s17 + $0x10] sm:$0xff]  ;;  %v580_v2 = vld [vmem:[%s165_s17 + $0x8] sm:$0xff] }
  0x11   : > { %v176_v3 = vsel %vm175_vm0, %v576_v0, 0.0  ;;  %v182_v4 = vsel %vm175_vm0, %v578_v1, 0.0  ;;  %v586_v5 = vld [vmem:[%s165_s17 + $0x18] sm:$0xff]  ;;  %v179_v6 = vsel %vm175_vm0, %v580_v2, 0.0 }
  0x12   : > { %177 = vadd.xlane.f32.xlu0 %v176_v3  ;;  %183 = vadd.xlane.f32.xlu1 %v182_v4  ;;  %v185_v7 = vsel %vm175_vm0, %v586_v5, 0.0 }
  0x16   : > { %180 = vadd.xlane.f32.xlu0 %v179_v6  ;;  %186 = vadd.xlane.f32.xlu1 %v185_v7 }
  0x9f   : > { %v178_v21 = vpop.xlane.xlu0 %177  ;;  %v184_v23 = vpop.xlane.xlu1 %183 }
  0xa0   : > { %v188_v25 = vmul.f32 0.0625, %v178_v21  ;;  %v190_v29 = vmul.f32 0.0625, %v184_v23 }
  0xa2   : > { %v205_v34 = vrot.slane %v188_v25, %v204_v24  ;;  %v217_v37 = vrot.slane %v190_v29, %v216_v28 }
  0xa3   : > { %v181_v30 = vpop.xlane.xlu0 %180  ;;  %v187_v31 = vpop.xlane.xlu1 %186 }
  0xa4   : > { %v189_v32 = vmul.f32 0.0625, %v181_v30  ;;  %v191_v33 = vmul.f32 0.0625, %v187_v31 }
  0xa6   : > { %v210_v35 = vrot.slane %v189_v32, %v209_v26  ;;  %v224_v36 = vrot.slane %v191_v33, %v223_v27 }
  0xa8   : > { %v212_v38 = vsel %vm211_vm2, %v210_v35, %v205_v34 }
  0xa9   : > { %v219_v39 = vsel %vm218_vm3, %v217_v37, %v212_v38 }
  0xaa   : > { %v226_v40 = vsel %vm225_vm4, %v224_v36, %v219_v39 }
  0xab   : > { %501 = vmatmul.mubr.msk.f32.vlgmr.msra.gmra.mrb[0].mxu0 %vm227_vm5, %v226_v40 }
 0x17e   : > { %v296_v42 = vpop.f32.mrb[0].mxu0 }
 0x17f   : > { %v300_v43 = vmax.f32 %v296_v42, 0.0  ;;  %v502_v44 = vpop.f32.mrb[1].mxu0 }
 0x181   : > { %506 = vmatmul.mubr.msk.f32.vlgmr.msra.gmra.mrb[0].mxu1 %vm302_vm7, %v300_v43 }
 0x254   : > { %v376_v45 = vpop.f32.mrb[0].mxu1 }
 0x255   : > { %v480_v46 = vmul.f32 -1.442695, %v376_v45  ;;  %v507_v47 = vpop.f32.mrb[1].mxu1 }
 0x257   : > { %525 = vpow2.f32 %v480_v46 }
 0x261   : > { %v526_v48 = vpop.eup %525 }
 0x262   : > { %v383_v49 = vadd.f32 1.0, %v526_v48 }
 0x264   : > { %527 = vrcp.f32 %v383_v49 }
 0x26e   : > { %v528_v51 = vpop.eup %527 }
 0x26f   : > { %v389_v52 = vrot.slane %v528_v51, %v388_v50 }
 0x271   : > { %395 = vbcast.lane.b32.xlu1 %v389_v52, 264  ;;  %391 = vbcast.lane.b32.xlu0 %v389_v52, 256 }
 0x275   : > { %399 = vbcast.lane.b32.xlu1 %v389_v52, 272 }
 0x279   : > { %403 = vbcast.lane.b32.xlu1 %v389_v52, 280 }
 0x2e3   : > { %v396_v53 = vpop.permute.xlu1 %395  ;;  %v392_v54 = vpop.permute.xlu0 %391 }
 0x2e4   : > { %v406_v55 = vmul.f32 %v396_v53, %v580_v2  ;;  %v405_v56 = vmul.f32 %v392_v54, %v576_v0 }
 0x2e6   : > { %410 = vst.msk [vmem:[%s170_s30 + $0x8] sm:$0xff] %vm175_vm0, %v406_v55  ;;  %409 = vst.msk [vmem:[%s170_s30] sm:$0xff] %vm175_vm0, %v405_v56 }
 0x2e7   : > { %v400_v57 = vpop.permute.xlu1 %399 }
 0x2e8   : > { %v407_v58 = vmul.f32 %v400_v57, %v578_v1 }
 0x2ea   : > { %411 = vst.msk [vmem:[%s170_s30 + $0x10] sm:$0xff] %vm175_vm0, %v407_v58 }
 0x2eb   : > { %v404_v59 = vpop.permute.xlu1 %403 }
 0x2ec   : > { %v408_v60 = vmul.f32 %v404_v59, %v586_v5 }
 0x2ee   : > { %412 = vst.msk [vmem:[%s170_s30 + $0x18] sm:$0xff] %vm175_vm0, %v408_v60 }
 0x2ef PF: > { %s13_s12 = sadd.s32 1, %s535_s12  }
 0x2f0   : > { %p10_p4 = scmp.ge.s32.totalorder %s13_s12, 4  }
 0x2f2   :  { %12 = sbr.rel (!%p10_p4) target bundleno = 1 (0x1), region = 62 }

</bundles_post_ra>
